<compile_context>
chip_gen: v7x
topology: tpu7x:2x2x1
jax: 0.10.0
libtpu: 0.0.40
codegen_flags: <defaults>
</compile_context>

<pallas_src>
import functools

import jax
import jax.numpy as jnp
import numpy as np
from jax import lax
from jax.experimental import pallas as pl
from jax.experimental.pallas import tpu as pltpu


def _round_up(x, m):
    return ((x + m - 1) // m) * m


def _vmem_budget_bytes():
    """Generation-aware (v5e/v6e: 128 MiB, v7x: 64 MiB) VMEM budget + scoped limit."""
    try:
        cap = int(getattr(pltpu.get_tpu_info(), "vmem_capacity_bytes", 64 << 20))
    except Exception:  # pragma: no cover - conservative fallback off-TPU / old jax
        cap = 64 << 20
    budget = min(cap // 2, 64 << 20)          # working-set budget with 2x headroom
    limit = min(budget + (8 << 20), cap)      # scoped vmem limit handed to Mosaic
    return budget, limit


def _working_set_bytes(lt, nb, c_in, c_out, k, halo, in_bytes, op_bytes, fuse):
    """Rough per-grid-step VMEM live bytes for a length tile of lt lanes."""
    hh = max(halo, 1)
    dbuf = 2 * (nb * c_in * lt * in_bytes + nb * c_out * lt * in_bytes)  # 2x-buffered tiles
    win = c_in * (hh + lt) * max(in_bytes, op_bytes)                     # per-row window
    stk = (k * c_in * lt * op_bytes) if (fuse and k > 1) else 0          # fused concat
    acc = c_out * lt * 4                                                 # f32 accumulator
    w = c_out * k * c_in * op_bytes
    carry = nb * c_in * hh * in_bytes
    head = 2 * nb * c_in * hh * in_bytes
    return dbuf + 2 * (win + stk + acc) + w + carry + head


def _pick_batch_block(n, c_in, itemsize):
    """Pack NB batch rows per grid step so NB*C_in roughly fills the sublane axis."""
    sublanes = {4: 8, 2: 16, 1: 32}.get(itemsize, 8)
    target = max(1, -(-sublanes // max(c_in, 1)))   # ceil(sublanes / c_in)
    target = min(target, 8, n)
    nb = 1
    for d in range(1, target + 1):                  # largest divisor of n that is <= target
        if n % d == 0:
            nb = d
    return nb


def _pick_l_tile(l_out, nb, c_in, c_out, k, halo, in_bytes, op_bytes, fuse,
                 vmem_budget, override=None, hbm_target_bytes=2 << 20):
    """Lane tile over output length: big enough to amortise per-step overhead (>= ~2 MB of
    x+out traffic per step), clamped so the live working set fits the VMEM budget."""
    if override is not None:
        if override >= l_out:
            return l_out
        return max(128, (int(override) // 128) * 128)
    io_per_lane = max(1, nb * (c_in + c_out) * in_bytes)
    lt = _round_up(max(512, hbm_target_bytes // io_per_lane), 128)
    lt = min(lt, 1 << 15)
    lt = min(lt, _round_up(l_out, 128))
    while lt > 128 and _working_set_bytes(lt, nb, c_in, c_out, k, halo,
                                          in_bytes, op_bytes, fuse) > vmem_budget:
        lt -= 128
    lt = max(lt, 128)
    if l_out <= lt:
        return l_out          # single full-length tile (full-dim block is always legal)
    return lt


def _conv1d_kernel(*refs, k_taps, dilation, halo, nb, fuse_taps, op_dtype, has_head):
    # refs (depending on configuration):
    #   [x_head_ref] x_ref w_ref b_ref o_ref [carry_ref]
    #   x_head_ref: (NB, C_in, hh)   first `halo` cols of the virtually padded input
    #   x_ref:      (NB, C_in, LT)   current length tile (aligned with the output tile)
    #   w_ref:      (C_out, K*C_in)  taps fused along the contraction dim (op_dtype)
    #   b_ref:      (C_out, 1)       float32
    #   o_ref:      (NB, C_out, LT)
    #   carry_ref:  (NB, C_in, hh)   halo carried from the previous length tile
    if halo > 0:
        if has_head:
            x_head_ref, x_ref, w_ref, b_ref, o_ref, carry_ref = refs
        else:
            x_ref, w_ref, b_ref, o_ref, carry_ref = refs
            x_head_ref = None
    else:
        x_ref, w_ref, b_ref, o_ref = refs
        x_head_ref = carry_ref = None

    j = pl.program_id(1)
    w = w_ref[...]                      # (C_out, K*C_in), already op_dtype
    b = b_ref[...]                      # (C_out, 1) float32
    c_out = w.shape[0]
    c_in = x_ref.shape[1]
    lt = x_ref.shape[2]

    if halo > 0:
        @pl.when(j == 0)
        def _init_carry():
            if has_head:
                carry_ref[...] = x_head_ref[...]
            else:
                # Causal case: virtual left padding is all zeros -> no HBM stream needed.
                carry_ref[...] = jnp.zeros_like(carry_ref)

    for i in range(nb):                 # static unroll over packed batch rows
        x_tile = x_ref[i]               # (C_in, LT)
        if halo > 0:
            # window[:, c] == x_padded[:, j*LT + c] for c in [0, halo + LT)
            window = jnp.concatenate([carry_ref[i], x_tile], axis=-1)
        else:
            window = x_tile             # kernel_size == 1 -> pointwise conv

        if fuse_taps:
            if k_taps > 1:
                taps = [window[:, t * dilation:t * dilation + lt] for t in range(k_taps)]
                stacked = jnp.concatenate(taps, axis=0)
            else:
                stacked = window
            acc = jnp.dot(w, stacked.astype(op_dtype),
                          preferred_element_type=jnp.float32)
        else:
            # Large channels: K accumulating dots, no materialised (K*C_in, LT) copy.
            acc = jnp.zeros((c_out, lt), jnp.float32)
            for t in range(k_taps):
                acc = acc + jnp.dot(
                    w[:, t * c_in:(t + 1) * c_in],
                    window[:, t * dilation:t * dilation + lt].astype(op_dtype),
                    preferred_element_type=jnp.float32)

        o_ref[i] = (acc + b).astype(o_ref.dtype)

        if halo > 0:
            # Halo for the next length tile: columns [LT, LT + halo) of the current window.
            carry_ref[i] = window[:, lt:lt + halo]


def custom_conv1d(x, weight, bias, *, padding, dilation, mxu_bf16=None, l_tile=None):
    """Matches CustomConv1d.forward: F.pad(x, (padding, 0)) then F.conv1d(..., dilation).

    x:      (N, C_in, L)      (PyTorch NCL layout)
    weight: (C_out, C_in, K)  (PyTorch conv1d weight layout)
    bias:   (C_out,)
    returns (N, C_out, L_out) with L_out = L + padding - dilation * (K - 1)
    """
    n, c_in, length = x.shape
    c_out, c_in_w, k = weight.shape
    assert c_in_w == c_in
    halo = dilation * (k - 1)
    l_out = length + padding - halo
    assert l_out > 0, "output length must be positive"

    in_dtype = x.dtype
    if mxu_bf16 is None:
        mxu_bf16 = (in_dtype == jnp.bfloat16)
    op_dtype = jnp.bfloat16 if mxu_bf16 else in_dtype

    hh = max(halo, 1)
    has_head = False
    if halo == 0:
        x_main = jnp.pad(x, ((0, 0), (0, 0), (padding, 0))) if padding else x
        x_head = None
    elif padding >= halo:
        # Causal WaveNet case: the halo head is all zeros -> zero-copy path, no head stream.
        x_main = x if padding == halo else jnp.pad(
            x, ((0, 0), (0, 0), (padding - halo, 0)))
        x_head = None
    else:  # padding < halo: the first (halo - padding) real samples live in the head
        has_head = True
        x_head = jnp.pad(x[..., :halo - padding], ((0, 0), (0, 0), (padding, 0)))
        x_main = x[..., halo - padding:]

    # Fuse the K taps into a single contraction: w2[o, t*C_in + c] = weight[o, c, t].
    w2 = jnp.transpose(weight, (0, 2, 1)).reshape(c_out, k * c_in).astype(op_dtype)
    b2 = bias.astype(jnp.float32).reshape(c_out, 1)

    in_bytes = jnp.dtype(in_dtype).itemsize
    op_bytes = jnp.dtype(op_dtype).itemsize
    fuse_taps = (k * c_in) <= 256            # fused single contraction only for small K*C_in

    nb = _pick_batch_block(n, c_in, in_bytes)
    vmem_budget, vmem_limit = _vmem_budget_bytes()
    lt = _pick_l_tile(l_out, nb, c_in, c_out, k, halo, in_bytes, op_bytes,
                      fuse_taps, vmem_budget, override=l_tile)
    num_l_tiles = pl.cdiv(l_out, lt)

    kernel = functools.partial(_conv1d_kernel, k_taps=k, dilation=dilation,
                               halo=halo, nb=nb, fuse_taps=fuse_taps,
                               op_dtype=op_dtype, has_head=has_head)

    in_specs = []
    inputs = []
    if has_head:
        in_specs.append(pl.BlockSpec((nb, c_in, hh), lambda b, j: (b, 0, 0)))
        inputs.append(x_head)
    in_specs += [
        pl.BlockSpec((nb, c_in, lt), lambda b, j: (b, 0, j)),
        pl.BlockSpec((c_out, k * c_in), lambda b, j: (0, 0)),
        pl.BlockSpec((c_out, 1), lambda b, j: (0, 0)),
    ]
    inputs += [x_main, w2, b2]

    scratch_shapes = []
    if halo > 0:
        scratch_shapes.append(pltpu.VMEM((nb, c_in, hh), in_dtype))

    flops = 2 * n * l_out * c_out * k * c_in
    bytes_accessed = (x_main.size * in_bytes + w2.size * op_bytes + b2.size * 4
                      + n * c_out * l_out * in_bytes
                      + (x_head.size * in_bytes if has_head else 0))

    return pl.pallas_call(
        kernel,
        out_shape=jax.ShapeDtypeStruct((n, c_out, l_out), in_dtype),
        grid_spec=pltpu.PrefetchScalarGridSpec(
            num_scalar_prefetch=0,
            grid=(n // nb, num_l_tiles),
            in_specs=in_specs,
            out_specs=pl.BlockSpec((nb, c_out, lt), lambda b, j: (b, 0, j)),
            scratch_shapes=scratch_shapes,
        ),
        compiler_params=pltpu.CompilerParams(
            dimension_semantics=("parallel", "arbitrary"),
            vmem_limit_bytes=int(vmem_limit)),
        cost_estimate=pl.CostEstimate(flops=int(flops), transcendentals=0,
                                      bytes_accessed=int(bytes_accessed)),
    )(*inputs)


def _reference_conv1d(x, weight, bias, *, padding, dilation):
    xp = jnp.pad(x, ((0, 0), (0, 0), (padding, 0)))
    y = lax.conv_general_dilated(
        xp, weight,
        window_strides=(1,),
        padding="VALID",
        rhs_dilation=(dilation,),
        dimension_numbers=("NCH", "OIH", "NCH"),
    )
    return y + bias[None, :, None]


def _check(x, weight, bias, *, padding, dilation, rtol=1e-5, atol=1e-5, **kw):
    y = jax.block_until_ready(custom_conv1d(x, weight, bias,
                                            padding=padding, dilation=dilation, **kw))
    y_ref = _reference_conv1d(x, weight, bias, padding=padding, dilation=dilation)
    np.testing.assert_allclose(np.asarray(y), np.asarray(y_ref), rtol=rtol, atol=atol)


if __name__ == "__main__":
    batch, in_channels, length = 2, 4, 16
    out_channels, kernel_size = 8, 3
    dilation = 2
    padding = dilation * (kernel_size - 1)   # causal padding (WaveNet convention)

    key = jax.random.PRNGKey(0)
    kx, kw, kb, kx2, kw2, kb2, kx3 = jax.random.split(key, 7)

    # Deterministic init matching the module: uniform(-k, k), k = sqrt(1/(C_in*K)).
    kval = float(np.sqrt(1.0 / (in_channels * kernel_size)))
    weight = jax.random.uniform(kw, (out_channels, in_channels, kernel_size),
                                jnp.float32, minval=-kval, maxval=kval)
    bias = jax.random.uniform(kb, (out_channels,), jnp.float32,
                              minval=-kval, maxval=kval)
    x = jax.random.normal(kx, (batch, in_channels, length), jnp.float32)

    # 1) Primary small causal case (single length tile, batch-packed NB=2, fused taps).
    _check(x, weight, bias, padding=padding, dilation=dilation)

    # 2) Multi-tile carry path (forced small length tile so the halo carry is exercised).
    x_long = jax.random.normal(kx2, (batch, in_channels, 700), jnp.float32)
    _check(x_long, weight, bias, padding=padding, dilation=dilation, l_tile=256)

    # 3) Non-causal padding (< dilation*(K-1)) exercising the x_head wrapper path.
    _check(x, weight, bias, padding=2, dilation=dilation)

    # 4) bf16-MXU-feed path (f32 accumulate) with a bf16-appropriate tolerance.
    _check(x, weight, bias, padding=padding, dilation=dilation,
           mxu_bf16=True, rtol=5e-2, atol=5e-2)

    # 5) Large-channel path (K*C_in > 256): K accumulating dots, no materialised concat.
    ci2, co2 = 320, 128
    kval2 = float(np.sqrt(1.0 / (ci2 * kernel_size)))
    w_big = jax.random.uniform(kw2, (co2, ci2, kernel_size), jnp.float32,
                               minval=-kval2, maxval=kval2)
    b_big = jax.random.uniform(kb2, (co2,), jnp.float32, minval=-kval2, maxval=kval2)
    x_big = jax.random.normal(kx3, (1, ci2, 512), jnp.float32)
    _check(x_big, w_big, b_big, padding=kernel_size - 1, dilation=1,
           rtol=1e-4, atol=1e-4)

    print("KERNEL_OK")
</pallas_src>

<mosaic_0001>
module attributes {stable_mosaic.version = 11 : i64} {
  func.func @_conv1d_kernel(%arg0: i32, %arg1: i32, %arg2: memref<2x4x16xf32, #tpu.memory_space<vmem>>, %arg3: memref<8x12xf32, #tpu.memory_space<vmem>>, %arg4: memref<8x1xf32, #tpu.memory_space<vmem>>, %arg5: memref<2x8x16xf32, #tpu.memory_space<vmem>>, %arg6: memref<2x4x4xf32, #tpu.memory_space<vmem>>) attributes {dimension_semantics = [#tpu.dimension_semantics<parallel>, #tpu.dimension_semantics<arbitrary>], iteration_bounds = array<i64: 1, 1>, scalar_prefetch = 0 : i64, scratch_operands = 1 : i64, tpu.core_type = #tpu.core_type<tc>, window_params = [{transform_indices = @transform_0, window_bounds = array<i64: 2, 4, 16>}, {pipeline_mode = #tpu.pipeline_mode<synchronous>, transform_indices = @transform_1, window_bounds = array<i64: 8, 12>}, {pipeline_mode = #tpu.pipeline_mode<synchronous>, transform_indices = @transform_2, window_bounds = array<i64: 8, 1>}, {transform_indices = @transform_3, window_bounds = array<i64: 2, 8, 16>}]} {
    %c0 = arith.constant 0 : index
    %c0_0 = arith.constant 0 : index
    %0 = vector.load %arg3[%c0, %c0_0] : memref<8x12xf32, #tpu.memory_space<vmem>>, vector<8x12xf32>
    %c0_1 = arith.constant 0 : index
    %c0_2 = arith.constant 0 : index
    %1 = vector.load %arg4[%c0_1, %c0_2] : memref<8x1xf32, #tpu.memory_space<vmem>>, vector<8x1xf32>
    %c0_i32 = arith.constant 0 : i32
    %2 = arith.cmpi eq, %arg1, %c0_i32 : i32
    %3 = arith.extui %2 : i1 to i32
    %c0_i32_3 = arith.constant 0 : i32
    %4 = arith.cmpi ne, %3, %c0_i32_3 : i32
    scf.if %4 {
      %cst_28 = arith.constant 0.000000e+00 : f32
      %43 = vector.broadcast %cst_28 : f32 to vector<2x4x4xf32>
      %c0_29 = arith.constant 0 : index
      %c0_30 = arith.constant 0 : index
      %c0_31 = arith.constant 0 : index
      %44 = vector.load %arg6[%c0_29, %c0_30, %c0_31] : memref<2x4x4xf32, #tpu.memory_space<vmem>>, vector<2x4x4xf32>
      tpu.vector_store %arg6[%c0_29, %c0_30, %c0_31], %43 {strides = array<i32>} : memref<2x4x4xf32, #tpu.memory_space<vmem>>, vector<2x4x4xf32>,
    } else {
    }
    %c0_4 = arith.constant 0 : index
    %c0_5 = arith.constant 0 : index
    %c0_6 = arith.constant 0 : index
    %5 = vector.load %arg2[%c0_4, %c0_5, %c0_6] : memref<2x4x16xf32, #tpu.memory_space<vmem>>, vector<1x4x16xf32>
    %6 = vector.shape_cast %5 : vector<1x4x16xf32> to vector<4x16xf32>
    %c0_7 = arith.constant 0 : index
    %c0_8 = arith.constant 0 : index
    %c0_9 = arith.constant 0 : index
    %7 = vector.load %arg6[%c0_7, %c0_8, %c0_9] : memref<2x4x4xf32, #tpu.memory_space<vmem>>, vector<1x4x4xf32>
    %8 = vector.shape_cast %7 : vector<1x4x4xf32> to vector<4x4xf32>
    %9 = tpu.concatenate %8, %6 in 1 : vector<4x4xf32>, vector<4x16xf32> -> vector<4x20xf32>
    %10 = vector.extract_strided_slice %9 {offsets = [0, 0], sizes = [4, 16], strides = [1, 1]} : vector<4x20xf32> to vector<4x16xf32>
    %11 = vector.extract_strided_slice %9 {offsets = [0, 2], sizes = [4, 16], strides = [1, 1]} : vector<4x20xf32> to vector<4x16xf32>
    %12 = vector.extract_strided_slice %9 {offsets = [0, 4], sizes = [4, 16], strides = [1, 1]} : vector<4x20xf32> to vector<4x16xf32>
    %13 = tpu.concatenate %10, %11, %12 in 0 : vector<4x16xf32>, vector<4x16xf32>, vector<4x16xf32> -> vector<12x16xf32>
    %cst = arith.constant dense<0.000000e+00> : vector<8x16xf32>
    %14 = tpu.matmul %0, %13, %cst {dimension_numbers = #tpu.dot_dimension_numbers<[1], [0], [0], [1], [0, 0, 1, 1], [], []>} : vector<8x12xf32>, vector<12x16xf32>, vector<8x16xf32> -> vector<8x16xf32>
    %15 = vector.broadcast %1 : vector<8x1xf32> to vector<8x16xf32>
    %16 = arith.addf %14, %15 : vector<8x16xf32>
    %c0_10 = arith.constant 0 : index
    %c0_11 = arith.constant 0 : index
    %c0_12 = arith.constant 0 : index
    %17 = vector.load %arg5[%c0_10, %c0_11, %c0_12] : memref<2x8x16xf32, #tpu.memory_space<vmem>>, vector<1x8x16xf32>
    %18 = vector.shape_cast %17 : vector<1x8x16xf32> to vector<8x16xf32>
    %19 = vector.shape_cast %16 : vector<8x16xf32> to vector<1x8x16xf32>
    tpu.vector_store %arg5[%c0_10, %c0_11, %c0_12], %19 {strides = array<i32>} : memref<2x8x16xf32, #tpu.memory_space<vmem>>, vector<1x8x16xf32>,
    %20 = vector.extract_strided_slice %9 {offsets = [0, 16], sizes = [4, 4], strides = [1, 1]} : vector<4x20xf32> to vector<4x4xf32>
    %c0_13 = arith.constant 0 : index
    %c0_14 = arith.constant 0 : index
    %c0_15 = arith.constant 0 : index
    %21 = vector.load %arg6[%c0_13, %c0_14, %c0_15] : memref<2x4x4xf32, #tpu.memory_space<vmem>>, vector<1x4x4xf32>
    %22 = vector.shape_cast %21 : vector<1x4x4xf32> to vector<4x4xf32>
    %23 = vector.shape_cast %20 : vector<4x4xf32> to vector<1x4x4xf32>
    tpu.vector_store %arg6[%c0_13, %c0_14, %c0_15], %23 {strides = array<i32>} : memref<2x4x4xf32, #tpu.memory_space<vmem>>, vector<1x4x4xf32>,
    %c1 = arith.constant 1 : index
    %c0_16 = arith.constant 0 : index
    %c0_17 = arith.constant 0 : index
    %24 = vector.load %arg2[%c1, %c0_16, %c0_17] : memref<2x4x16xf32, #tpu.memory_space<vmem>>, vector<1x4x16xf32>
    %25 = vector.shape_cast %24 : vector<1x4x16xf32> to vector<4x16xf32>
    %c1_18 = arith.constant 1 : index
    %c0_19 = arith.constant 0 : index
    %c0_20 = arith.constant 0 : index
    %26 = vector.load %arg6[%c1_18, %c0_19, %c0_20] : memref<2x4x4xf32, #tpu.memory_space<vmem>>, vector<1x4x4xf32>
    %27 = vector.shape_cast %26 : vector<1x4x4xf32> to vector<4x4xf32>
    %28 = tpu.concatenate %27, %25 in 1 : vector<4x4xf32>, vector<4x16xf32> -> vector<4x20xf32>
    %29 = vector.extract_strided_slice %28 {offsets = [0, 0], sizes = [4, 16], strides = [1, 1]} : vector<4x20xf32> to vector<4x16xf32>
    %30 = vector.extract_strided_slice %28 {offsets = [0, 2], sizes = [4, 16], strides = [1, 1]} : vector<4x20xf32> to vector<4x16xf32>
    %31 = vector.extract_strided_slice %28 {offsets = [0, 4], sizes = [4, 16], strides = [1, 1]} : vector<4x20xf32> to vector<4x16xf32>
    %32 = tpu.concatenate %29, %30, %31 in 0 : vector<4x16xf32>, vector<4x16xf32>, vector<4x16xf32> -> vector<12x16xf32>
    %cst_21 = arith.constant dense<0.000000e+00> : vector<8x16xf32>
    %33 = tpu.matmul %0, %32, %cst_21 {dimension_numbers = #tpu.dot_dimension_numbers<[1], [0], [0], [1], [0, 0, 1, 1], [], []>} : vector<8x12xf32>, vector<12x16xf32>, vector<8x16xf32> -> vector<8x16xf32>
    %34 = vector.broadcast %1 : vector<8x1xf32> to vector<8x16xf32>
    %35 = arith.addf %33, %34 : vector<8x16xf32>
    %c1_22 = arith.constant 1 : index
    %c0_23 = arith.constant 0 : index
    %c0_24 = arith.constant 0 : index
    %36 = vector.load %arg5[%c1_22, %c0_23, %c0_24] : memref<2x8x16xf32, #tpu.memory_space<vmem>>, vector<1x8x16xf32>
    %37 = vector.shape_cast %36 : vector<1x8x16xf32> to vector<8x16xf32>
    %38 = vector.shape_cast %35 : vector<8x16xf32> to vector<1x8x16xf32>
    tpu.vector_store %arg5[%c1_22, %c0_23, %c0_24], %38 {strides = array<i32>} : memref<2x8x16xf32, #tpu.memory_space<vmem>>, vector<1x8x16xf32>,
    %39 = vector.extract_strided_slice %28 {offsets = [0, 16], sizes = [4, 4], strides = [1, 1]} : vector<4x20xf32> to vector<4x4xf32>
    %c1_25 = arith.constant 1 : index
    %c0_26 = arith.constant 0 : index
    %c0_27 = arith.constant 0 : index
    %40 = vector.load %arg6[%c1_25, %c0_26, %c0_27] : memref<2x4x4xf32, #tpu.memory_space<vmem>>, vector<1x4x4xf32>
    %41 = vector.shape_cast %40 : vector<1x4x4xf32> to vector<4x4xf32>
    %42 = vector.shape_cast %39 : vector<4x4xf32> to vector<1x4x4xf32>
    tpu.vector_store %arg6[%c1_25, %c0_26, %c0_27], %42 {strides = array<i32>} : memref<2x4x4xf32, #tpu.memory_space<vmem>>, vector<1x4x4xf32>,
    return
  }
  func.func @transform_0(%arg0: i32, %arg1: i32) -> (i32, i32, i32) {
    %c0_i32 = arith.constant 0 : i32
    %c0_i32_0 = arith.constant 0 : i32
    return %arg0, %c0_i32, %arg1 : i32, i32, i32
  }
  func.func @transform_1(%arg0: i32, %arg1: i32) -> (i32, i32) {
    %c0_i32 = arith.constant 0 : i32
    %c0_i32_0 = arith.constant 0 : i32
    %c0_i32_1 = arith.constant 0 : i32
    return %c0_i32, %c0_i32_0 : i32, i32
  }
  func.func @transform_2(%arg0: i32, %arg1: i32) -> (i32, i32) {
    %c0_i32 = arith.constant 0 : i32
    %c0_i32_0 = arith.constant 0 : i32
    %c0_i32_1 = arith.constant 0 : i32
    return %c0_i32, %c0_i32_0 : i32, i32
  }
  func.func @transform_3(%arg0: i32, %arg1: i32) -> (i32, i32, i32) {
    %c0_i32 = arith.constant 0 : i32
    %c0_i32_0 = arith.constant 0 : i32
    return %arg0, %c0_i32, %arg1 : i32, i32, i32
  }
}

</mosaic_0001>

<bundles_post_ra>
// kernel: tpu_custom_call.1
= control target key start
LH: loop header
LB: loop body
LE: loop exit
PB: predicated region body
PF: predicated region fallthrough
CT: control target
= control target key end

     0   :  { %8 = vsyncpa [#allocation4], 0  ;;  %s428_s0 = inlined_call_operand.vmem [shape: f32[2,4,16], index: 0, kind: input, shape index: {}]   ;;  %s429_s1 = inlined_call_operand.hbm [shape: f32[8,12], index: 1, kind: input, shape index: {}]   ;;  %s430_s2 = inlined_call_operand.vmem [shape: f32[8,1], index: 2, kind: input, shape index: {}]   ;;  %s431_s3 = inlined_call_operand.hbm [shape: f32[2,8,16], index: 3, kind: output, shape index: {}]  }
   0x1   :  { %9 = vsyncpa [#allocation5], 0  ;;  %s358_s12 = smov [#allocation3]   ;;  %s310_s16 = scalar_lea.hbm %s429_s1, 128 }
   0x2   :  { %s18_s13 = sshll.u32 %s358_s12, 4  ;;  %p311_p0 = scmp.ne.s32.totalorder %s429_s1, %s310_s16  ;;  %s19_s13 = int_to_ptr.vmem [resolvable:$true] %s18_s13 }
   0x3   :  { %p314_p1 = scmp.lt.u32.totalorder %s310_s16, %s429_s1 }
   0x5   :  { %p316_p2 = pnand %p314_p1, %p311_p0 }
   0x7   :  { %319 = shalt.err (!%p316_p2)
}
   0x8   :  { %s320_s21 = scalar_lea.vmem %s19_s13, 128  ;;  %p325_p4 = scmp.lt.s32.totalorder %s19_s13, %s19_s13 }
   0x9   :  { %p321_p3 = scmp.ne.s32.totalorder %s19_s13, %s320_s21  ;;  %p326_p5 = scmp.lt.s32.totalorder %s320_s21, %s320_s21 }
   0xb   :  { %p327_p6 = por %p326_p5, %p325_p4 }
   0xd   :  { %p328_p7 = pnand %p327_p6, %p321_p3 }
   0xf   :  { %331 = shalt.err (!%p328_p7)
}
  0x10   :  { %21 = dma.hbm_to_vmem [thread:$0]  %s429_s1, 128, %s19_s13, [#allocation4]  }
  0x11   :  { %354 = dma.done.wait [#allocation4], 128  }
  0x12   :  { %355 = vsyncadd [#allocation4], 4294967168  ;;  %vm33_vm0 = vcmask 27648   ;;  %v359_v0 = vmov 0.0   ;;  %v36_v1 = vld [vmem:[%s428_s0] sm:$0xf] }
  0x13   :  { %34 = vst.msk [vmem:[#allocation2] sm:$0xf] %vm33_vm0, %v359_v0  ;;  %35 = vst.msk [vmem:[#allocation2 + $0x4] sm:$0xf] %vm33_vm0, %v359_v0  ;;  %s360_s26 = smov 4   ;;  %vm42_vm1 = vcmask 31744  }
  0x14   :  { %39 = vrot.lane.b32.xlu0 %v36_v1, %s360_s26  ;;  %v255_v2 = vld [vmem:[%s428_s0 + $0x4] sm:$0xf]  ;;  %v361_v8 = vmov 0.0|0.0   ;;  %vm362_vm2 = vmmov 0   ;;  %s363_s0 = smov 126   ;;  %v364_v14 = vmov 0  }
  0x15   :  { %278 = vmatprep.subr.bf16.mxu0 %v361_v8  ;;  %282 = vmatprep.subr.bf16.mxu1 %v361_v8  ;;  %v28_v13 = vld [vmem:[%s430_s2] sm:$0xff]  ;;  %s365_s30 = smov 124   ;;  %s366_s4 = smov 112   ;;  %vm51_vm3 = vcmask 1043456   ;;  %vm367_vm4 = vmmov 1   ;;  %v27_v27 = vld [vmem:[#allocation3] sm:$0xff] }
  0x16   :  { %268 = vmatprep.mubr.msk.f32.mxu0 %vm362_vm2, %v359_v0  ;;  %275 = vmatprep.mubr.msk.f32.mxu1 %vm362_vm2, %v359_v0  ;;  %vm280_vm5 = vmpackc.low %vm51_vm3, %vm367_vm4  ;;  %vm58_vm6 = vcmask 97280   ;;  %s368_s2 = smov [#allocation6]   ;;  %vm134_vm7 = vcmask 130048  }
  0x17   :  { %309 = vset.pattern.permute.xlu0 %v364_v14  ;;  %s241_s5 = sshll.u32 %s368_s2, 4  ;;  %s242_s5 = int_to_ptr.vmem [resolvable:$true] %s241_s5 }
  0x18   :  { %146 = vrot.lane.b32.xlu0 %v255_v2, %s360_s26  ;;  %s332_s6 = scalar_lea.vmem %s242_s5, 256  ;;  %p337_p9 = scmp.lt.s32.totalorder %s242_s5, %s242_s5 }
  0x19   :  { %p333_p8 = scmp.ne.s32.totalorder %s242_s5, %s332_s6  ;;  %p338_p10 = scmp.lt.s32.totalorder %s332_s6, %s332_s6 }
  0x1a   :  { %v37_v4 = vld [vmem:[#allocation2] sm:$0xf]  ;;  %v144_v5 = vld [vmem:[#allocation2 + $0x4] sm:$0xf] }
  0x1b   :  { %p339_p11 = por %p338_p10, %p337_p9 }
  0x1c   :  { %55 = vperm.xlu0 %309, %v28_v13  }
  0x1d   :  { %p340_p12 = pnand %p339_p11, %p333_p8 }
  0x86   :  { %v40_v3 = vpop.permute.xlu0 %39 }
  0x87   :  { %v43_v6 = vsel %vm42_vm1, %v37_v4, %v40_v3 }
  0x88   :  { %v45_v10 = vrot.slane %v43_v6, 4 }
  0x8a   :  { %v147_v7 = vpop.permute.xlu0 %146 }
  0x8b   :  { %v149_v9 = vsel %vm42_vm1, %v144_v5, %v147_v7 }
  0x8c   :  { %v151_v11 = vrot.slane %v149_v9, 4  ;;  %v304_v15 = vpack.i.bf16 %v149_v9, %v43_v6 }
  0x8e   :  { %v299_v12 = vpack.i.bf16 %v151_v11, %v45_v10 }
  0x90   :  { %300 = vrot.lane.b32.xlu1 %v299_v12, %s363_s0 }
  0x94   :  { %305 = vrot.lane.b32.xlu1 %v304_v15, %s365_s30 }
  0x98   :  { %136 = vrot.lane.b32.xlu1 %v43_v6, %s366_s4 }
  0x9b   :  { %v56_v29 = vpop.permute.xlu0 %55 }
  0x9c   :  { %232 = vrot.lane.b32.xlu1 %v149_v9, %s366_s4 }
 0x102   :  { %v301_v16 = vpop.permute.xlu1 %300 }
 0x103   :  { %v303_v17 = vunpack.i.h.bf16 %v301_v16  ;;  %v302_v18 = vunpack.i.l.bf16 %v301_v16 }
 0x105   :  { %v52_v22 = vsel %vm51_vm3, %v43_v6, %v302_v18  ;;  %v157_v23 = vsel %vm51_vm3, %v149_v9, %v303_v17 }
 0x106   :  { %v306_v19 = vpop.permute.xlu1 %305 }
 0x107   :  { %v308_v20 = vunpack.i.h.bf16 %v306_v19  ;;  %v307_v21 = vunpack.i.l.bf16 %v306_v19 }
 0x109   :  { %v279_v24 = vpack.c.bf16 %v307_v21, %v52_v22  ;;  %v283_v25 = vpack.c.bf16 %v308_v20, %v157_v23 }
 0x10a   :  { %v137_v26 = vpop.permute.xlu1 %136 }
 0x10b   :  { %140 = vst.msk [vmem:[#allocation2] sm:$0xf] %vm33_vm0, %v137_v26  ;;  %281 = vmatpush3.bf16.msk.msra.mxu0 %vm280_vm5, %v279_v24  ;;  %285 = vmatpush3.bf16.msk.msra.mxu1 %vm280_vm5, %v283_v25 }
 0x10e   :  { %v233_v28 = vpop.permute.xlu1 %232  ;;  %269 = vmatmul.mubr.msk.f32.vlgmr.msra.gmra.mrb[0].mxu0 %vm58_vm6, %v27_v27  ;;  %276 = vmatmul.mubr.msk.f32.vlgmr.msra.gmra.mrb[0].mxu1 %vm58_vm6, %v27_v27 }
 0x10f   :  { %235 = vst.msk [vmem:[#allocation2 + $0x4] sm:$0xf] %vm33_vm0, %v233_v28 }
 0x1e1   :  { %v130_v30 = vpop.f32.mrb[0].mxu0  ;;  %v226_v31 = vpop.f32.mrb[0].mxu1 }
 0x1e2   :  { %v131_v32 = vadd.f32 %v130_v30, %v56_v29  ;;  %v227_v33 = vadd.f32 %v226_v31, %v56_v29  ;;  %v270_v34 = vpop.f32.mrb[1].mxu0  ;;  %v277_v35 = vpop.f32.mrb[1].mxu1 }
 0x1e4   :  { %135 = vst.msk [vmem:[#allocation6] sm:$0xff] %vm134_vm7, %v131_v32  ;;  %231 = vst.msk [vmem:[#allocation6 + $0x8] sm:$0xff] %vm134_vm7, %v227_v33 }
 0x1e5   :  { %343 = shalt.err (!%p340_p12)
}
 0x1e6   :  { %s344_s9 = scalar_lea.hbm %s431_s3, 256 }
 0x1e7   :  { %p345_p13 = scmp.ne.s32.totalorder %s431_s3, %s344_s9  ;;  %p348_p0 = scmp.lt.u32.totalorder %s344_s9, %s431_s3 }
 0x1e9   :  { %p350_p1 = pnand %p348_p0, %p345_p13 }
 0x1eb   :  { %353 = shalt.err (!%p350_p1)
}
 0x1ec   :  { %s369_s14 = smov 128   ;;  %s370_s15 = smov 8  }
 0x1ed   :  { %247 = dma.vmem_to_hbm [thread:$0]  %s242_s5, 256, %s431_s3, [#allocation5], %s369_s14, %s369_s14, %s370_s15  }
 0x1ee   :  { %356 = dma.done.wait [#allocation5], 256  }
 0x1ef   :  { %357 = vsyncadd [#allocation5], 4294967040 }
 0x1f0   :  { %251 = vsyncpa [#allocation4], 1 }
 0x1f1   :  { %252 = vsyncpa [#allocation5], 1 }

</bundles_post_ra>
